<compile_context>
chip_gen: v6e
topology: v6e:2x2x1
jax: 0.10.0
libtpu: 0.0.40
codegen_flags: <defaults>
</compile_context>

<pallas_src>
import jax
import jax.numpy as jnp
from jax.experimental import pallas as pl
from jax.experimental.pallas import tpu as pltpu


def _cdiv(a, b):
    return (a + b - 1) // b


def _round_up(x, m):
    return (x + m - 1) // m * m


# -----------------------------------------------------------------------------
# One-time parameter preprocessing (NOT in the per-call path).
# -----------------------------------------------------------------------------
def prepare_params(params, num_sensors, weight_dtype=jnp.float32):
    """Fold the 1x1 convs into transposed block-diagonal matrices, bake the
    PyTorch flatten permutation into layer1, and lay everything out for the
    transposed (features, batch) dataflow.

    weight_dtype=jnp.bfloat16 halves weight DMA/VMEM and uses the bf16 MXU
    path (largest relative win on v5e); it relaxes exact f32 numerics so it
    is off by default.
    """
    wc1, bc1, wc2, bc2, w1, b1, w2, b2, w3, b3 = params
    N = num_sensors
    C1 = wc1.shape[0]            # 32
    C2 = wc2.shape[0]            # 64
    H1, H2, NS = w1.shape[0], w2.shape[0], w3.shape[0]
    NC1, NC2 = C1 * N, C2 * N    # 96, 192
    f32 = jnp.float32

    # conv1 (1 -> C1 channels, 1x1): t1[n*C1 + c, b] = wc1[c] * x[n, b] + bc1[c]
    wc1_col = wc1.reshape(C1, 1).astype(f32)
    bc1_col = bc1.reshape(C1, 1).astype(f32)

    # conv2 (C1 -> C2, 1x1) as a transposed block-diagonal matrix:
    #   t2[n*C2 + c2, b] = sum_c1 wc2[c2, c1] * t1[n*C1 + c1, b] + bc2[c2]
    wc2_m = wc2.reshape(C2, C1).astype(f32)
    A_c2 = jnp.zeros((NC2, NC1), f32)
    for n in range(N):
        A_c2 = A_c2.at[n * C2:(n + 1) * C2, n * C1:(n + 1) * C1].set(wc2_m)
    bc2_col = jnp.tile(bc2.reshape(C2, 1).astype(f32), (N, 1))      # (NC2, 1)

    # layer1: PyTorch flatten order f = c*N + n ; our t2 order f' = n*C2 + c.
    # Permute the columns once so no in-kernel shuffle is needed.
    A_1 = w1.astype(f32).reshape(H1, C2, N).transpose(0, 2, 1).reshape(H1, NC2)
    b1_col = b1.reshape(H1, 1).astype(f32)
    A_2 = w2.astype(f32)                                             # (H2, H1)
    b2_col = b2.reshape(H2, 1).astype(f32)
    A_3 = w3.astype(f32)                                             # (NS, H2)
    b3_col = b3.reshape(NS, 1).astype(f32)

    wd = weight_dtype
    weights = (wc1_col, bc1_col,                 # conv1 stays f32 (VPU path)
               A_c2.astype(wd), bc2_col,
               A_1.astype(wd), b1_col,
               A_2.astype(wd), b2_col,
               A_3.astype(wd), b3_col)
    cfg = dict(N=N, C1=C1, C2=C2, H1=H1, H2=H2, NS=NS, NC1=NC1, NC2=NC2,
               weight_dtype=wd)
    return weights, cfg


# -----------------------------------------------------------------------------
# Kernel
# -----------------------------------------------------------------------------
def _make_kernel(cfg):
    N = cfg["N"]
    wd = cfg["weight_dtype"]
    f32 = jnp.float32

    def kernel(x_ref, wc1_ref, bc1_ref, ac2_ref, bc2_ref, a1_ref, b1_ref,
               a2_ref, b2_ref, a3_ref, b3_ref, out_ref):
        xT = x_ref[...]                       # (N, bm): batch on the lane axis
        wc1 = wc1_ref[...]                    # (C1, 1)
        bc1 = bc1_ref[...]                    # (C1, 1)

        # conv1 (1x1, 1 -> C1 channels) on the VPU: a K=3 MXU matmul would waste
        # ~98% of a pass, so do N static broadcast multiply-adds instead.
        parts = []
        for n in range(N):                    # N = 3, static -> unrolled
            xn = xT[n:n + 1, :]               # (1, bm)
            parts.append(jnp.maximum(wc1 * xn + bc1, 0.0))   # (C1, bm)
        t1 = jnp.concatenate(parts, axis=0)   # (N*C1, bm)

        def dense(w_ref, b_ref, act, relu):
            y = jnp.dot(w_ref[...], act.astype(wd),
                        preferred_element_type=f32) + b_ref[...]
            return jnp.maximum(y, 0.0) if relu else y

        t2 = dense(ac2_ref, bc2_ref, t1, True)     # conv2 + ReLU   (N*C2, bm)
        t3 = dense(a1_ref, b1_ref, t2, True)       # layer1 + ReLU  (H1,  bm)
        # dropout(p=0.2) -> identity (inference path)
        t4 = dense(a2_ref, b2_ref, t3, True)       # layer2 + ReLU  (H2,  bm)
        # dropout -> identity
        out_ref[...] = dense(a3_ref, b3_ref, t4, False).astype(out_ref.dtype)

    return kernel


def make_forward(cfg, *, max_batch_block=2048, small_batch=256,
                 vmem_limit_bytes=32 * 1024 * 1024):
    """Build a jitted forward(x, weights) for a fixed parameter configuration.

    x is batch-major (B, N); it is transposed to (N, B) outside the kernel
    (tiny XLA op) so batch maps to lanes inside the kernel.
    """
    kernel = _make_kernel(cfg)
    N, NS = cfg["N"], cfg["NS"]

    @jax.jit
    def fwd(x, weights):
        B = x.shape[0]
        xT = x.T                               # (N, B)

        if B <= small_batch:
            # Tiny batch: gridless invocation, everything resident in VMEM.
            vmem = pl.BlockSpec(memory_space=pltpu.MemorySpace.VMEM)
            outT = pl.pallas_call(
                kernel,
                out_shape=jax.ShapeDtypeStruct((NS, B), jnp.float32),
                in_specs=[vmem] * (1 + len(weights)),
                out_specs=vmem,
            )(xT, *weights)
            return outT.T

        # Large batch: 1-D "parallel" grid over lane-dense batch blocks.
        # bm chosen so there are >= 2 grid steps (both v7x TensorCores get work)
        # and capped so f32 activations stay well inside VMEM on every chip.
        bm = max(128, min(max_batch_block, _round_up(_cdiv(B, 2), 128)))
        grid = (_cdiv(B, bm),)
        # Weights: full-array resident blocks with constant index_map -> one DMA
        # each, no re-copy across grid steps, no misaligned column slicing.
        w_specs = [pl.BlockSpec(w.shape, lambda i: (0, 0)) for w in weights]
        outT = pl.pallas_call(
            kernel,
            out_shape=jax.ShapeDtypeStruct((NS, B), jnp.float32),
            grid_spec=pltpu.PrefetchScalarGridSpec(
                num_scalar_prefetch=0,
                grid=grid,
                in_specs=[pl.BlockSpec((N, bm), lambda i: (0, i))] + w_specs,
                out_specs=pl.BlockSpec((NS, bm), lambda i: (0, i))),
            compiler_params=pltpu.CompilerParams(
                dimension_semantics=("parallel",),
                vmem_limit_bytes=vmem_limit_bytes),
        )(xT, *weights)
        return outT.T

    return fwd


# -----------------------------------------------------------------------------
# Synthetic init + pure-JAX reference (mirrors the PyTorch forward, dropout=id)
# -----------------------------------------------------------------------------
def init_params(key, num_sensors=3, params_cfg=(32, 32)):
    H1, H2 = params_cfg
    ks = jax.random.split(key, 10)
    f32 = jnp.float32
    wc1 = 0.1 * jax.random.normal(ks[0], (32, 1, 1, 1), f32)
    bc1 = 0.1 * jax.random.normal(ks[1], (32,), f32)
    wc2 = 0.1 * jax.random.normal(ks[2], (64, 32, 1, 1), f32)
    bc2 = 0.1 * jax.random.normal(ks[3], (64,), f32)
    w1 = 0.1 * jax.random.normal(ks[4], (H1, 64 * num_sensors), f32)
    b1 = 0.1 * jax.random.normal(ks[5], (H1,), f32)
    w2 = 0.1 * jax.random.normal(ks[6], (H2, H1), f32)
    b2 = 0.1 * jax.random.normal(ks[7], (H2,), f32)
    w3 = 0.1 * jax.random.normal(ks[8], (num_sensors, H2), f32)
    b3 = 0.1 * jax.random.normal(ks[9], (num_sensors,), f32)
    return (wc1, bc1, wc2, bc2, w1, b1, w2, b2, w3, b3)


def reference_forward(x, params):
    (wc1, bc1, wc2, bc2, w1, b1, w2, b2, w3, b3) = params
    B, N = x.shape
    y1 = jnp.maximum(x[:, None, :] * wc1.reshape(32)[None, :, None]
                     + bc1[None, :, None], 0.0)                        # (B,32,N)
    y2 = jnp.maximum(jnp.einsum('oc,bcn->bon', wc2.reshape(64, 32), y1)
                     + bc2[None, :, None], 0.0)                        # (B,64,N)
    flat = y2.reshape(B, 64 * N)                                       # f = c*N + n
    h1 = jnp.maximum(flat @ w1.T + b1, 0.0)
    h2 = jnp.maximum(h1 @ w2.T + b2, 0.0)
    return h2 @ w3.T + b3


if __name__ == "__main__":
    key = jax.random.PRNGKey(0)
    kx, kp = jax.random.split(key)

    num_sensors = 3                 # 192 = 64 * num_sensors  =>  num_sensors = 3
    params_cfg = (32, 32)           # params[0], params[1] in the PyTorch __init__
    params = init_params(kp, num_sensors, params_cfg)

    # One-time preprocessing: folded / permuted / transposed weights (f32 exact).
    weights, cfg = prepare_params(params, num_sensors)
    fwd = make_forward(cfg)

    # Small batch: gridless path.
    B = 2
    x = jax.random.normal(kx, (B, num_sensors), jnp.float32)
    out = jax.block_until_ready(fwd(x, weights))
    ref = reference_forward(x, params)
    assert out.shape == (B, num_sensors)
    assert jnp.allclose(out, ref, atol=1e-4, rtol=1e-4), (out, ref)

    # Gridded path: exact multiple of the batch block (2 "parallel" grid steps).
    B2 = 512
    x2 = jax.random.normal(jax.random.fold_in(kx, 1), (B2, num_sensors), jnp.float32)
    out2 = jax.block_until_ready(fwd(x2, weights))
    ref2 = reference_forward(x2, params)
    assert out2.shape == (B2, num_sensors)
    assert jnp.allclose(out2, ref2, atol=1e-4, rtol=1e-4)

    # Gridded path with a ragged final batch block (masked lane stores).
    B3 = 1000
    x3 = jax.random.normal(jax.random.fold_in(kx, 2), (B3, num_sensors), jnp.float32)
    out3 = jax.block_until_ready(fwd(x3, weights))
    ref3 = reference_forward(x3, params)
    assert out3.shape == (B3, num_sensors)
    assert jnp.allclose(out3, ref3, atol=1e-4, rtol=1e-4)

    print("KERNEL_OK")
</pallas_src>

<mosaic_0001>
module attributes {stable_mosaic.version = 11 : i64} {
  func.func @kernel(%arg0: memref<3x2xf32, #tpu.memory_space<vmem>>, %arg1: memref<32x1xf32, #tpu.memory_space<vmem>>, %arg2: memref<32x1xf32, #tpu.memory_space<vmem>>, %arg3: memref<192x96xf32, #tpu.memory_space<vmem>>, %arg4: memref<192x1xf32, #tpu.memory_space<vmem>>, %arg5: memref<32x192xf32, #tpu.memory_space<vmem>>, %arg6: memref<32x1xf32, #tpu.memory_space<vmem>>, %arg7: memref<32x32xf32, #tpu.memory_space<vmem>>, %arg8: memref<32x1xf32, #tpu.memory_space<vmem>>, %arg9: memref<3x32xf32, #tpu.memory_space<vmem>>, %arg10: memref<3x1xf32, #tpu.memory_space<vmem>>, %arg11: memref<3x2xf32, #tpu.memory_space<vmem>>) attributes {dimension_semantics = [], scalar_prefetch = 0 : i64, scratch_operands = 0 : i64, tpu.core_type = #tpu.core_type<tc>} {
    %c0 = arith.constant 0 : index
    %c0_0 = arith.constant 0 : index
    %0 = vector.load %arg0[%c0, %c0_0] : memref<3x2xf32, #tpu.memory_space<vmem>>, vector<3x2xf32>
    %c0_1 = arith.constant 0 : index
    %c0_2 = arith.constant 0 : index
    %1 = vector.load %arg1[%c0_1, %c0_2] : memref<32x1xf32, #tpu.memory_space<vmem>>, vector<32x1xf32>
    %c0_3 = arith.constant 0 : index
    %c0_4 = arith.constant 0 : index
    %2 = vector.load %arg2[%c0_3, %c0_4] : memref<32x1xf32, #tpu.memory_space<vmem>>, vector<32x1xf32>
    %3 = vector.extract_strided_slice %0 {offsets = [0, 0], sizes = [1, 2], strides = [1, 1]} : vector<3x2xf32> to vector<1x2xf32>
    %4 = vector.broadcast %1 : vector<32x1xf32> to vector<32x2xf32>
    %5 = vector.broadcast %3 : vector<1x2xf32> to vector<32x2xf32>
    %6 = arith.mulf %4, %5 : vector<32x2xf32>
    %7 = vector.broadcast %2 : vector<32x1xf32> to vector<32x2xf32>
    %8 = arith.addf %6, %7 : vector<32x2xf32>
    %cst = arith.constant 0.000000e+00 : f32
    %9 = vector.broadcast %cst : f32 to vector<32x2xf32>
    %10 = arith.maximumf %8, %9 : vector<32x2xf32>
    %11 = vector.extract_strided_slice %0 {offsets = [1, 0], sizes = [1, 2], strides = [1, 1]} : vector<3x2xf32> to vector<1x2xf32>
    %12 = vector.broadcast %1 : vector<32x1xf32> to vector<32x2xf32>
    %13 = vector.broadcast %11 : vector<1x2xf32> to vector<32x2xf32>
    %14 = arith.mulf %12, %13 : vector<32x2xf32>
    %15 = vector.broadcast %2 : vector<32x1xf32> to vector<32x2xf32>
    %16 = arith.addf %14, %15 : vector<32x2xf32>
    %cst_5 = arith.constant 0.000000e+00 : f32
    %17 = vector.broadcast %cst_5 : f32 to vector<32x2xf32>
    %18 = arith.maximumf %16, %17 : vector<32x2xf32>
    %19 = vector.extract_strided_slice %0 {offsets = [2, 0], sizes = [1, 2], strides = [1, 1]} : vector<3x2xf32> to vector<1x2xf32>
    %20 = vector.broadcast %1 : vector<32x1xf32> to vector<32x2xf32>
    %21 = vector.broadcast %19 : vector<1x2xf32> to vector<32x2xf32>
    %22 = arith.mulf %20, %21 : vector<32x2xf32>
    %23 = vector.broadcast %2 : vector<32x1xf32> to vector<32x2xf32>
    %24 = arith.addf %22, %23 : vector<32x2xf32>
    %cst_6 = arith.constant 0.000000e+00 : f32
    %25 = vector.broadcast %cst_6 : f32 to vector<32x2xf32>
    %26 = arith.maximumf %24, %25 : vector<32x2xf32>
    %27 = tpu.concatenate %10, %18, %26 in 0 : vector<32x2xf32>, vector<32x2xf32>, vector<32x2xf32> -> vector<96x2xf32>
    %c0_7 = arith.constant 0 : index
    %c0_8 = arith.constant 0 : index
    %28 = vector.load %arg3[%c0_7, %c0_8] : memref<192x96xf32, #tpu.memory_space<vmem>>, vector<192x96xf32>
    %cst_9 = arith.constant dense<0.000000e+00> : vector<192x2xf32>
    %29 = tpu.matmul %28, %27, %cst_9 {dimension_numbers = #tpu.dot_dimension_numbers<[1], [0], [0], [1], [0, 0, 1, 1], [], []>} : vector<192x96xf32>, vector<96x2xf32>, vector<192x2xf32> -> vector<192x2xf32>
    %c0_10 = arith.constant 0 : index
    %c0_11 = arith.constant 0 : index
    %30 = vector.load %arg4[%c0_10, %c0_11] : memref<192x1xf32, #tpu.memory_space<vmem>>, vector<192x1xf32>
    %31 = vector.broadcast %30 : vector<192x1xf32> to vector<192x2xf32>
    %32 = arith.addf %29, %31 : vector<192x2xf32>
    %cst_12 = arith.constant 0.000000e+00 : f32
    %33 = vector.broadcast %cst_12 : f32 to vector<192x2xf32>
    %34 = arith.maximumf %32, %33 : vector<192x2xf32>
    %c0_13 = arith.constant 0 : index
    %c0_14 = arith.constant 0 : index
    %35 = vector.load %arg5[%c0_13, %c0_14] : memref<32x192xf32, #tpu.memory_space<vmem>>, vector<32x192xf32>
    %cst_15 = arith.constant dense<0.000000e+00> : vector<32x2xf32>
    %36 = tpu.matmul %35, %34, %cst_15 {dimension_numbers = #tpu.dot_dimension_numbers<[1], [0], [0], [1], [0, 0, 1, 1], [], []>} : vector<32x192xf32>, vector<192x2xf32>, vector<32x2xf32> -> vector<32x2xf32>
    %c0_16 = arith.constant 0 : index
    %c0_17 = arith.constant 0 : index
    %37 = vector.load %arg6[%c0_16, %c0_17] : memref<32x1xf32, #tpu.memory_space<vmem>>, vector<32x1xf32>
    %38 = vector.broadcast %37 : vector<32x1xf32> to vector<32x2xf32>
    %39 = arith.addf %36, %38 : vector<32x2xf32>
    %cst_18 = arith.constant 0.000000e+00 : f32
    %40 = vector.broadcast %cst_18 : f32 to vector<32x2xf32>
    %41 = arith.maximumf %39, %40 : vector<32x2xf32>
    %c0_19 = arith.constant 0 : index
    %c0_20 = arith.constant 0 : index
    %42 = vector.load %arg7[%c0_19, %c0_20] : memref<32x32xf32, #tpu.memory_space<vmem>>, vector<32x32xf32>
    %cst_21 = arith.constant dense<0.000000e+00> : vector<32x2xf32>
    %43 = tpu.matmul %42, %41, %cst_21 {dimension_numbers = #tpu.dot_dimension_numbers<[1], [0], [0], [1], [0, 0, 1, 1], [], []>} : vector<32x32xf32>, vector<32x2xf32>, vector<32x2xf32> -> vector<32x2xf32>
    %c0_22 = arith.constant 0 : index
    %c0_23 = arith.constant 0 : index
    %44 = vector.load %arg8[%c0_22, %c0_23] : memref<32x1xf32, #tpu.memory_space<vmem>>, vector<32x1xf32>
    %45 = vector.broadcast %44 : vector<32x1xf32> to vector<32x2xf32>
    %46 = arith.addf %43, %45 : vector<32x2xf32>
    %cst_24 = arith.constant 0.000000e+00 : f32
    %47 = vector.broadcast %cst_24 : f32 to vector<32x2xf32>
    %48 = arith.maximumf %46, %47 : vector<32x2xf32>
    %c0_25 = arith.constant 0 : index
    %c0_26 = arith.constant 0 : index
    %49 = vector.load %arg9[%c0_25, %c0_26] : memref<3x32xf32, #tpu.memory_space<vmem>>, vector<3x32xf32>
    %cst_27 = arith.constant dense<0.000000e+00> : vector<3x2xf32>
    %50 = tpu.matmul %49, %48, %cst_27 {dimension_numbers = #tpu.dot_dimension_numbers<[1], [0], [0], [1], [0, 0, 1, 1], [], []>} : vector<3x32xf32>, vector<32x2xf32>, vector<3x2xf32> -> vector<3x2xf32>
    %c0_28 = arith.constant 0 : index
    %c0_29 = arith.constant 0 : index
    %51 = vector.load %arg10[%c0_28, %c0_29] : memref<3x1xf32, #tpu.memory_space<vmem>>, vector<3x1xf32>
    %52 = vector.broadcast %51 : vector<3x1xf32> to vector<3x2xf32>
    %53 = arith.addf %50, %52 : vector<3x2xf32>
    %c0_30 = arith.constant 0 : index
    %c0_31 = arith.constant 0 : index
    %54 = vector.load %arg11[%c0_30, %c0_31] : memref<3x2xf32, #tpu.memory_space<vmem>>, vector<3x2xf32>
    tpu.vector_store %arg11[%c0_30, %c0_31], %53 {strides = array<i32>} : memref<3x2xf32, #tpu.memory_space<vmem>>, vector<3x2xf32>,
    return
  }
}

</mosaic_0001>

<bundles_post_ra>
// kernel: fwd.1
= control target key start
LH: loop header
LB: loop body
LE: loop exit
PB: predicated region body
PF: predicated region fallthrough
CT: control target
= control target key end

     0   :  { %v1107_v0 = vmov 0   ;;  %vm303_vm0 = vcmask 785408   ;;  %v67_v43 = vlaneseq  ;;  %vm617_vm1 = vcmask 523264   ;;  %s1499_s2 = inlined_call_operand.vmem [shape: f32[32,1], index: 2, kind: input, shape index: {}]   ;;  %s1500_s1 = inlined_call_operand.vmem [shape: f32[32,1], index: 1, kind: input, shape index: {}]   ;;  %s1501_s4 = inlined_call_operand.vmem [shape: f32[192,1], index: 4, kind: input, shape index: {}]   ;;  %s1502_s3 = inlined_call_operand.vmem [shape: f32[192,96], index: 3, kind: input, shape index: {}]   ;;  %s1503_s6 = inlined_call_operand.vmem [shape: f32[32,1], index: 6, kind: input, shape index: {}]   ;;  %s1504_s8 = inlined_call_operand.vmem [shape: f32[32,1], index: 8, kind: input, shape index: {}]   ;;  %s1505_s10 = inlined_call_operand.vmem [shape: f32[3,1], index: 10, kind: input, shape index: {}]   ;;  %s1506_s0 = inlined_call_operand.vmem [shape: f32[3,2], index: 0, kind: input, shape index: {}]   ;;  %s1507_s5 = inlined_call_operand.vmem [shape: f32[32,192], index: 5, kind: input, shape index: {}]   ;;  %s1508_s7 = inlined_call_operand.vmem [shape: f32[32,32], index: 7, kind: input, shape index: {}]   ;;  %s1509_s9 = inlined_call_operand.vmem [shape: f32[3,32], index: 9, kind: input, shape index: {}]   ;;  %s1510_s11 = inlined_call_operand.vmem [shape: f32[3,2], index: 11, kind: output, shape index: {}]  }
   0x1   :  { %1106 = vset.pattern.permute.xlu1 %v1107_v0  ;;  %1105 = vset.pattern.permute.xlu0 %v1107_v0  ;;  %v46_v1 = vld [vmem:[%s1499_s2 + $0x18] sm:$0xff]  ;;  %v41_v3 = vld [vmem:[%s1500_s1 + $0x10] sm:$0xff]  ;;  %v40_v4 = vld [vmem:[%s1500_s1 + $0x8] sm:$0xff]  ;;  %vm747_vm2 = vcmask 261120   ;;  %vm1109_vm3 = vmmov 0   ;;  %vm929_vm4 = vcmask 10240  }
   0x2   :  { %v42_v2 = vld [vmem:[%s1500_s1 + $0x18] sm:$0xff]  ;;  %92 = vperm.xlu1 %1106, %v46_v1   ;;  %v45_v5 = vld [vmem:[%s1499_s2 + $0x10] sm:$0xff]  ;;  %v39_v6 = vld [vmem:[%s1500_s1] sm:$0xff]  ;;  %v68_v44 = vshrl.u32 %v67_v43, 7 }
   0x3   :  { %64 = vperm.xlu0 %1105, %v42_v2   ;;  %v44_v7 = vld [vmem:[%s1499_s2 + $0x8] sm:$0xff]  ;;  %v43_v8 = vld [vmem:[%s1499_s2] sm:$0xff]  ;;  %v174_v9 = vld [vmem:[%s1501_s4 + $0x78] sm:$0xff] }
   0x4   :  { %v173_v10 = vld [vmem:[%s1501_s4 + $0x70] sm:$0xff]  ;;  %v172_v11 = vld [vmem:[%s1501_s4 + $0x68] sm:$0xff]  ;;  %v171_v12 = vld [vmem:[%s1501_s4 + $0x60] sm:$0xff]  ;;  %v121_v45 = vsub.s32 2, %v68_v44  ;;  %v105_v51 = vsub.s32 1, %v68_v44  ;;  %v69_v61 = vsub.s32 0, %v68_v44 }
   0x5   :  { %v170_v13 = vld [vmem:[%s1501_s4 + $0x58] sm:$0xff]  ;;  %v169_v14 = vld [vmem:[%s1501_s4 + $0x50] sm:$0xff]  ;;  %v168_v15 = vld [vmem:[%s1501_s4 + $0x48] sm:$0xff] }
   0x6   :  { %54 = vperm.xlu1 %1106, %v40_v4   ;;  %v167_v16 = vld [vmem:[%s1501_s4 + $0x40] sm:$0xff]  ;;  %v166_v17 = vld [vmem:[%s1501_s4 + $0x38] sm:$0xff]  ;;  %v165_v18 = vld [vmem:[%s1501_s4 + $0x30] sm:$0xff] }
   0x7   :  { %59 = vperm.xlu0 %1105, %v41_v3   ;;  %v135_v19 = vld [vmem:[%s1502_s3] sm:$0xff]  ;;  %v164_v20 = vld [vmem:[%s1501_s4 + $0x28] sm:$0xff]  ;;  %v162_v22 = vld [vmem:[%s1501_s4 + $0x18] sm:$0xff] }
   0x8   :  { %v163_v21 = vld [vmem:[%s1501_s4 + $0x20] sm:$0xff]  ;;  %1041 = vmatprep.mubr.msk.f32.mxu0 %vm303_vm0, %v135_v19  ;;  %v161_v23 = vld [vmem:[%s1501_s4 + $0x10] sm:$0xff]  ;;  %v160_v24 = vld [vmem:[%s1501_s4 + $0x8] sm:$0xff] }
   0x9   :  { %v159_v25 = vld [vmem:[%s1501_s4] sm:$0xff]  ;;  %v182_v26 = vld [vmem:[%s1501_s4 + $0xb8] sm:$0xff]  ;;  %v181_v27 = vld [vmem:[%s1501_s4 + $0xb0] sm:$0xff] }
   0xa   :  { %49 = vperm.xlu1 %1106, %v39_v6   ;;  %v180_v28 = vld [vmem:[%s1501_s4 + $0xa8] sm:$0xff]  ;;  %v179_v29 = vld [vmem:[%s1501_s4 + $0xa0] sm:$0xff]  ;;  %v178_v30 = vld [vmem:[%s1501_s4 + $0x98] sm:$0xff] }
   0xb   :  { %87 = vperm.xlu0 %1105, %v45_v5   ;;  %v177_v31 = vld [vmem:[%s1501_s4 + $0x90] sm:$0xff]  ;;  %v176_v32 = vld [vmem:[%s1501_s4 + $0x88] sm:$0xff]  ;;  %v175_v33 = vld [vmem:[%s1501_s4 + $0x80] sm:$0xff] }
   0xc   :  { %v596_v34 = vld [vmem:[%s1503_s6 + $0x18] sm:$0xff]  ;;  %v595_v35 = vld [vmem:[%s1503_s6 + $0x10] sm:$0xff]  ;;  %v594_v36 = vld [vmem:[%s1503_s6 + $0x8] sm:$0xff] }
   0xd   :  { %v593_v37 = vld [vmem:[%s1503_s6] sm:$0xff]  ;;  %v726_v38 = vld [vmem:[%s1504_s8 + $0x18] sm:$0xff]  ;;  %v725_v39 = vld [vmem:[%s1504_s8 + $0x10] sm:$0xff] }
   0xe   :  { %77 = vperm.xlu1 %1106, %v43_v8   ;;  %v724_v40 = vld [vmem:[%s1504_s8 + $0x8] sm:$0xff]  ;;  %v723_v41 = vld [vmem:[%s1504_s8] sm:$0xff] }
   0xf   :  { %82 = vperm.xlu0 %1105, %v44_v7   ;;  %v850_v42 = vld [vmem:[%s1505_s10] sm:$0x7]  ;;  %v148_v44 = vld [vmem:[%s1502_s3 + $0x68] sm:$0xff] }
  0x10   :  { %v38_v46 = vld [vmem:[%s1506_s0] sm:$0x7] }
  0x11   :  { %v122_v47 = vrot.slane %v38_v46, %v121_v45  ;;  %v106_v56 = vrot.slane %v38_v46, %v105_v51  ;;  %v70_v6 = vrot.slane %v38_v46, %v69_v61  ;;  %v147_v43 = vld [vmem:[%s1502_s3 + $0x60] sm:$0xff]  ;;  %v149_v45 = vld [vmem:[%s1502_s3 + $0x70] sm:$0xff]  ;;  %v150_v46 = vld [vmem:[%s1502_s3 + $0x78] sm:$0xff] }
  0x12   :  { %255 = vperm.xlu1 %1106, %v173_v10   ;;  %v155_v51 = vld [vmem:[%s1502_s3 + $0xa0] sm:$0xff] }
  0x13   :  { %260 = vperm.xlu0 %1105, %v174_v9  }
  0x16   :  { %245 = vperm.xlu1 %1106, %v171_v12  }
  0x17   :  { %250 = vperm.xlu0 %1105, %v172_v11  }
  0x1a   :  { %235 = vperm.xlu1 %1106, %v169_v14  }
  0x1b   :  { %240 = vperm.xlu0 %1105, %v170_v13  }
  0x1e   :  { %225 = vperm.xlu1 %1106, %v167_v16  }
  0x1f   :  { %230 = vperm.xlu0 %1105, %v168_v15  }
  0x22   :  { %215 = vperm.xlu1 %1106, %v165_v18  }
  0x23   :  { %220 = vperm.xlu0 %1105, %v166_v17  }
  0x26   :  { %205 = vperm.xlu1 %1106, %v163_v21  }
  0x27   :  { %210 = vperm.xlu0 %1105, %v164_v20  }
  0x2a   :  { %195 = vperm.xlu1 %1106, %v161_v23  }
  0x2b   :  { %200 = vperm.xlu0 %1105, %v162_v22  }
  0x2e   :  { %185 = vperm.xlu1 %1106, %v159_v25  }
  0x2f   :  { %190 = vperm.xlu0 %1105, %v160_v24  }
  0x32   :  { %295 = vperm.xlu1 %1106, %v181_v27  }
  0x33   :  { %300 = vperm.xlu0 %1105, %v182_v26  }
  0x36   :  { %285 = vperm.xlu1 %1106, %v179_v29  }
  0x37   :  { %290 = vperm.xlu0 %1105, %v180_v28  }
  0x3a   :  { %275 = vperm.xlu1 %1106, %v177_v31  }
  0x3b   :  { %280 = vperm.xlu0 %1105, %v178_v30  }
  0x3e   :  { %265 = vperm.xlu1 %1106, %v175_v33   ;;  %v137_v33 = vld [vmem:[%s1502_s3 + $0x10] sm:$0xff] }
  0x3f   :  { %270 = vperm.xlu0 %1105, %v176_v32   ;;  %v136_v32 = vld [vmem:[%s1502_s3 + $0x8] sm:$0xff] }
  0x42   :  { %609 = vperm.xlu1 %1106, %v595_v35   ;;  %v139_v35 = vld [vmem:[%s1502_s3 + $0x20] sm:$0xff] }
  0x43   :  { %614 = vperm.xlu0 %1105, %v596_v34   ;;  %v138_v34 = vld [vmem:[%s1502_s3 + $0x18] sm:$0xff] }
  0x46   :  { %599 = vperm.xlu1 %1106, %v593_v37   ;;  %v141_v37 = vld [vmem:[%s1502_s3 + $0x30] sm:$0xff] }
  0x47   :  { %604 = vperm.xlu0 %1105, %v594_v36   ;;  %v140_v36 = vld [vmem:[%s1502_s3 + $0x28] sm:$0xff] }
  0x4a   :  { %739 = vperm.xlu1 %1106, %v725_v39   ;;  %v143_v39 = vld [vmem:[%s1502_s3 + $0x40] sm:$0xff] }
  0x4b   :  { %744 = vperm.xlu0 %1105, %v726_v38   ;;  %v142_v38 = vld [vmem:[%s1502_s3 + $0x38] sm:$0xff] }
  0x4e   :  { %729 = vperm.xlu1 %1106, %v723_v41   ;;  %v145_v41 = vld [vmem:[%s1502_s3 + $0x50] sm:$0xff] }
  0x4f   :  { %734 = vperm.xlu0 %1105, %v724_v40   ;;  %v144_v40 = vld [vmem:[%s1502_s3 + $0x48] sm:$0xff] }
  0x53   :  { %853 = vperm.xlu0 %1105, %v850_v42   ;;  %v146_v42 = vld [vmem:[%s1502_s3 + $0x58] sm:$0xff] }
  0x7d   :  { %v93_v48 = vpop.permute.xlu1 %92 }
  0x7e   :  { %v65_v49 = vpop.permute.xlu0 %64 }
  0x7f   :  { %v126_v50 = vmul.f32 %v122_v47, %v65_v49  ;;  %v110_v62 = vmul.f32 %v106_v56, %v65_v49  ;;  %v74_v13 = vmul.f32 %v70_v6, %v65_v49  ;;  %v153_v49 = vld [vmem:[%s1502_s3 + $0x90] sm:$0xff] }
  0x81   :  { %v130_v52 = vadd.f32 %v126_v50, %v93_v48  ;;  %v55_v54 = vpop.permute.xlu1 %54  ;;  %v114_v9 = vadd.f32 %v110_v62, %v93_v48  ;;  %v98_v21 = vadd.f32 %v93_v48, %v74_v13  ;;  %v152_v48 = vld [vmem:[%s1502_s3 + $0x88] sm:$0xff]  ;;  %v154_v50 = vld [vmem:[%s1502_s3 + $0x98] sm:$0xff] }
  0x82   :  { %v60_v53 = vpop.permute.xlu0 %59  ;;  %v124_v63 = vmul.f32 %v122_v47, %v55_v54  ;;  %v108_v10 = vmul.f32 %v106_v56, %v55_v54  ;;  %v72_v22 = vmul.f32 %v70_v6, %v55_v54  ;;  %v158_v54 = vld [vmem:[%s1502_s3 + $0xb8] sm:$0xff] }
  0x83   :  { %v134_v55 = vmax.f32 %v130_v52, 0.0  ;;  %v125_v57 = vmul.f32 %v122_v47, %v60_v53  ;;  %v109_v7 = vmul.f32 %v106_v56, %v60_v53  ;;  %v118_v16 = vmax.f32 %v114_v9, 0.0  ;;  %v156_v52 = vld [vmem:[%s1502_s3 + $0xa8] sm:$0xff] }
  0x84   :  { %v73_v19 = vmul.f32 %v70_v6, %v60_v53  ;;  %v102_v27 = vmax.f32 %v98_v21, 0.0  ;;  %v157_v53 = vld [vmem:[%s1502_s3 + $0xb0] sm:$0xff] }
  0x85   :  { %1017 = vmatprep.subr.mxu0 %v134_v55  ;;  %v50_v59 = vpop.permute.xlu1 %49 }
  0x86   :  { %v88_v58 = vpop.permute.xlu0 %87  ;;  %1018 = vmatpush3.msra.mxu0 %v134_v55  ;;  %v123_v1 = vmul.f32 %v122_v47, %v50_v59  ;;  %v107_v14 = vmul.f32 %v106_v56, %v50_v59  ;;  %v71_v25 = vmul.f32 %v70_v6, %v50_v59  ;;  %v151_v47 = vld [vmem:[%s1502_s3 + $0x80] sm:$0xff]  ;;  %v1108_v55 = vmov 0.0   ;;  %v586_v56 = vld [vmem:[%s1507_s5 + $0x8] sm:$0xff] }
  0x87   :  { %v129_v60 = vadd.f32 %v125_v57, %v88_v58  ;;  %v113_v11 = vadd.f32 %v109_v7, %v88_v58  ;;  %v97_v23 = vadd.f32 %v88_v58, %v73_v19  ;;  %630 = vmatprep.subr.mxu1 %v1108_v55  ;;  %959 = vmatprep.mubr.msk.f32.mxu1 %vm617_vm1, %v586_v56 }
  0x89   :  { %v133_v0 = vmax.f32 %v129_v60, 0.0  ;;  %v78_v3 = vpop.permute.xlu1 %77  ;;  %v117_v18 = vmax.f32 %v113_v11, 0.0  ;;  %v101_v29 = vmax.f32 %v97_v23, 0.0 }
  0x8a   :  { %v83_v2 = vpop.permute.xlu0 %82  ;;  %v127_v5 = vadd.f32 %v123_v1, %v78_v3  ;;  %v111_v17 = vadd.f32 %v107_v14, %v78_v3  ;;  %v95_v28 = vadd.f32 %v78_v3, %v71_v25 }
  0x8b   :  { %v128_v4 = vadd.f32 %v124_v63, %v83_v2  ;;  %1019 = vmatprep.subr.mxu0 %v133_v0  ;;  %v112_v15 = vadd.f32 %v108_v10, %v83_v2  ;;  %v96_v26 = vadd.f32 %v83_v2, %v72_v22 }
  0x8c   :  { %1020 = vmatpush3.msra.mxu0 %v133_v0  ;;  %v131_v12 = vmax.f32 %v127_v5, 0.0  ;;  %v115_v24 = vmax.f32 %v111_v17, 0.0  ;;  %v99_v31 = vmax.f32 %v95_v28, 0.0 }
  0x8d   :  { %v132_v8 = vmax.f32 %v128_v4, 0.0  ;;  %v116_v20 = vmax.f32 %v112_v15, 0.0  ;;  %v100_v30 = vmax.f32 %v96_v26, 0.0  ;;  %v256_v61 = vpop.permute.xlu1 %255 }
  0x8e   :  { %v261_v59 = vpop.permute.xlu0 %260 }
  0x8f   :  { %1021 = vmatprep.subr.mxu0 %v132_v8 }
  0x90   :  { %1022 = vmatpush3.msra.mxu0 %v132_v8 }
  0x91   :  { %1023 = vmatprep.subr.mxu0 %v131_v12  ;;  %v246_v2 = vpop.permute.xlu1 %245 }
  0x92   :  { %1024 = vmatpush3.msra.mxu0 %v131_v12  ;;  %v251_v0 = vpop.permute.xlu0 %250 }
  0x93   :  { %1025 = vmatprep.subr.mxu0 %v118_v16 }
  0x94   :  { %1026 = vmatpush3.msra.mxu0 %v118_v16 }
  0x95   :  { %1027 = vmatprep.subr.mxu0 %v117_v18  ;;  %v236_v7 = vpop.permute.xlu1 %235 }
  0x96   :  { %1028 = vmatpush3.msra.mxu0 %v117_v18  ;;  %v241_v5 = vpop.permute.xlu0 %240 }
  0x97   :  { %1029 = vmatprep.subr.mxu0 %v116_v20 }
  0x98   :  { %1030 = vmatpush3.msra.mxu0 %v116_v20 }
  0x99   :  { %1031 = vmatprep.subr.mxu0 %v115_v24  ;;  %v226_v12 = vpop.permute.xlu1 %225 }
  0x9a   :  { %1032 = vmatpush3.msra.mxu0 %v115_v24  ;;  %v231_v10 = vpop.permute.xlu0 %230 }
  0x9b   :  { %1033 = vmatprep.subr.mxu0 %v102_v27 }
  0x9c   :  { %1034 = vmatpush3.msra.mxu0 %v102_v27 }
  0x9d   :  { %1035 = vmatprep.subr.mxu0 %v101_v29  ;;  %v216_v18 = vpop.permute.xlu1 %215 }
  0x9e   :  { %1036 = vmatpush3.msra.mxu0 %v101_v29  ;;  %v221_v15 = vpop.permute.xlu0 %220 }
  0x9f   :  { %1037 = vmatprep.subr.mxu0 %v100_v30 }
  0xa0   :  { %1038 = vmatpush3.msra.mxu0 %v100_v30 }
  0xa1   :  { %1039 = vmatprep.subr.mxu0 %v99_v31  ;;  %v206_v30 = vpop.permute.xlu1 %205 }
  0xa2   :  { %1040 = vmatpush3.msra.mxu0 %v99_v31  ;;  %v211_v26 = vpop.permute.xlu0 %210 }
  0xa3   :  { %1042 = vmatmul.mubr.msk.f32.vlgmr.msra.gmra.mxu0 %vm303_vm0, %v136_v32  ;;  %1091 = vmatprep.subr.mxu0 %v1108_v55 }
  0xa4   :  { %1044 = vmatprep.mubr.msk.f32.mxu0 %vm303_vm0, %v137_v33 }
  0xa7   :  { %1045 = vmatmul.mubr.msk.f32.gmra.mxu0 %vm303_vm0, %v138_v34 }
  0xa8   :  { %1047 = vmatprep.mubr.msk.f32.mxu0 %vm303_vm0, %v139_v35 }
  0xab   :  { %1048 = vmatmul.mubr.msk.f32.gmra.mxu0 %vm303_vm0, %v140_v36  ;;  %v201_v36 = vpop.permute.xlu0 %200 }
  0xac   :  { %1050 = vmatprep.mubr.msk.f32.mxu0 %vm303_vm0, %v141_v37 }
  0xaf   :  { %1051 = vmatmul.mubr.msk.f32.gmra.mxu0 %vm303_vm0, %v142_v38 }
  0xb0   :  { %1053 = vmatprep.mubr.msk.f32.mxu0 %vm303_vm0, %v143_v39  ;;  %v196_v39 = vpop.permute.xlu1 %195 }
  0xb3   :  { %1054 = vmatmul.mubr.msk.f32.gmra.mxu0 %vm303_vm0, %v144_v40 }
  0xb4   :  { %1056 = vmatprep.mubr.msk.f32.mxu0 %vm303_vm0, %v145_v41 }
  0xb7   :  { %1057 = vmatmul.mubr.msk.f32.gmra.mxu0 %vm303_vm0, %v146_v42 }
  0xb8   :  { %1059 = vmatprep.mubr.msk.f32.mxu0 %vm303_vm0, %v147_v43 }
  0xbb   :  { %1060 = vmatmul.mubr.msk.f32.gmra.mxu0 %vm303_vm0, %v148_v44 }
  0xbc   :  { %1062 = vmatprep.mubr.msk.f32.mxu0 %vm303_vm0, %v149_v45  ;;  %v191_v45 = vpop.permute.xlu0 %190 }
  0xbf   :  { %1063 = vmatmul.mubr.msk.f32.gmra.mxu0 %vm303_vm0, %v150_v46 }
  0xc0   :  { %1065 = vmatprep.mubr.msk.f32.mxu0 %vm303_vm0, %v151_v47  ;;  %v301_v56 = vpop.permute.xlu0 %300 }
  0xc3   :  { %1066 = vmatmul.mubr.msk.f32.gmra.mxu0 %vm303_vm0, %v152_v48 }
  0xc4   :  { %1068 = vmatprep.mubr.msk.f32.mxu0 %vm303_vm0, %v153_v49  ;;  %v186_v49 = vpop.permute.xlu1 %185 }
  0xc7   :  { %1069 = vmatmul.mubr.msk.f32.gmra.mxu0 %vm303_vm0, %v154_v50 }
  0xc8   :  { %1071 = vmatprep.mubr.msk.f32.mxu0 %vm303_vm0, %v155_v51 }
  0xcb   :  { %1072 = vmatmul.mubr.msk.f32.gmra.mxu0 %vm303_vm0, %v156_v52 }
  0xcc   :  { %1074 = vmatprep.mubr.msk.f32.mxu0 %vm303_vm0, %v157_v53 }
  0xcf   :  { %1075 = vmatmul.mubr.msk.f32.gmra.mxu0 %vm303_vm0, %v158_v54 }
  0xd0   :  { %1099 = vmatprep.mubr.msk.f32.mxu0 %vm1109_vm3, %v1108_v55 }
 0x163   :  { %v1398_v57 = vpop.f32.mrf.mxu0 }
 0x165   :  { %v1400_v58 = vpop.f32.mrf.mxu0 }
 0x167   :  { %v1402_v60 = vpop.f32.mrf.mxu0 }
 0x168   :  { %v458_v53 = vadd.f32 %v1402_v60, %v201_v36  ;;  %v443_v60 = vadd.f32 %v1400_v58, %v186_v49 }
 0x169   :  { %v1404_v62 = vpop.f32.mrf.mxu0 }
 0x16b   :  { %v1049_v63 = vpop.f32.mrf.mxu0 }
 0x16c   :  { %v468_v47 = vadd.f32 %v1049_v63, %v211_v26  ;;  %v296_v63 = vpop.permute.xlu1 %295 }
 0x16d   :  { %v1406_v1 = vpop.f32.mrf.mxu0 }
 0x16e   :  { %v463_v50 = vadd.f32 %v1406_v1, %v206_v30  ;;  %v566_v54 = vmax.f32 %v468_v47, 0.0  ;;  %v448_v1 = vadd.f32 %v1398_v57, %v191_v45  ;;  %v589_v30 = vld [vmem:[%s1507_s5 + $0x20] sm:$0xff] }
 0x16f   :  { %v1052_v3 = vpop.f32.mrf.mxu0 }
 0x170   :  { %v478_v41 = vadd.f32 %v1052_v3, %v221_v15 }
 0x171   :  { %v472_v4 = vpop.f32.mrf.mxu0 }
 0x172   :  { %v473_v43 = vadd.f32 %v472_v4, %v216_v18  ;;  %v568_v48 = vmax.f32 %v478_v41, 0.0  ;;  %v291_v4 = vpop.permute.xlu0 %290 }
 0x173   :  { %v1055_v6 = vpop.f32.mrf.mxu0 }
 0x174   :  { %v488_v34 = vadd.f32 %v1055_v6, %v231_v10  ;;  %v567_v51 = vmax.f32 %v473_v43, 0.0 }
 0x175   :  { %v482_v8 = vpop.f32.mrf.mxu0 }
 0x176   :  { %v483_v37 = vadd.f32 %v482_v8, %v226_v12  ;;  %v570_v42 = vmax.f32 %v488_v34, 0.0  ;;  %v561_v8 = vmax.f32 %v443_v60, 0.0  ;;  %v281_v58 = vpop.permute.xlu0 %280 }
 0x177   :  { %v1058_v9 = vpop.f32.mrf.mxu0 }
 0x178   :  { %v498_v28 = vadd.f32 %v1058_v9, %v241_v5  ;;  %v569_v44 = vmax.f32 %v483_v37, 0.0 }
 0x179   :  { %v492_v11 = vpop.f32.mrf.mxu0 }
 0x17a   :  { %v493_v31 = vadd.f32 %v492_v11, %v236_v7  ;;  %v572_v35 = vmax.f32 %v498_v28, 0.0  ;;  %v286_v7 = vpop.permute.xlu1 %285  ;;  %v271_v18 = vpop.permute.xlu0 %270  ;;  %v587_v28 = vld [vmem:[%s1507_s5 + $0x10] sm:$0xff] }
 0x17b   :  { %v1061_v13 = vpop.f32.mrf.mxu0 }
 0x17c   :  { %v508_v20 = vadd.f32 %v1061_v13, %v251_v0  ;;  %v571_v38 = vmax.f32 %v493_v31, 0.0  ;;  %v592_v31 = vld [vmem:[%s1507_s5 + $0x38] sm:$0xff] }
 0x17d   :  { %v502_v14 = vpop.f32.mrf.mxu0 }
 0x17e   :  { %v503_v24 = vadd.f32 %v502_v14, %v246_v2  ;;  %v574_v29 = vmax.f32 %v508_v20, 0.0  ;;  %v564_v2 = vmax.f32 %v458_v53, 0.0  ;;  %v276_v13 = vpop.permute.xlu1 %275 }
 0x17f   :  { %v1064_v16 = vpop.f32.mrf.mxu0 }
 0x180   :  { %v518_v17 = vadd.f32 %v1064_v16, %v261_v59  ;;  %v573_v32 = vmax.f32 %v503_v24, 0.0  ;;  %v453_v59 = vadd.f32 %v1404_v62, %v196_v39  ;;  %v562_v62 = vmax.f32 %v448_v1, 0.0 }
 0x181   :  { %v512_v19 = vpop.f32.mrf.mxu0 }
 0x182   :  { %v576_v21 = vmax.f32 %v518_v17, 0.0  ;;  %v513_v22 = vadd.f32 %v512_v19, %v256_v61  ;;  %v565_v61 = vmax.f32 %v463_v50, 0.0  ;;  %v563_v3 = vmax.f32 %v453_v59, 0.0  ;;  %v722_v59 = vld [vmem:[%s1508_s7 + $0x18] sm:$0xff] }
 0x183   :  { %v1408_v23 = vpop.f32.mrf.mxu0 }
 0x184   :  { %v575_v25 = vmax.f32 %v513_v22, 0.0  ;;  %631 = vmatpush1.msra.mxu1 %v576_v21  ;;  %v528_v19 = vadd.f32 %v1408_v23, %v271_v18  ;;  %v266_v21 = vpop.permute.xlu1 %265  ;;  %v585_v23 = vld [vmem:[%s1507_s5] sm:$0xff] }
 0x185   :  { %v1410_v27 = vpop.f32.mrf.mxu0  ;;  %632 = vmatprep.subr.mxu1 %v1108_v55 }
 0x186   :  { %633 = vmatpush1.msra.mxu1 %v575_v25  ;;  %v523_v22 = vadd.f32 %v1410_v27, %v266_v21  ;;  %v578_v25 = vmax.f32 %v528_v19, 0.0  ;;  %v588_v27 = vld [vmem:[%s1507_s5 + $0x18] sm:$0xff] }
 0x187   :  { %634 = vmatprep.subr.mxu1 %v1108_v55  ;;  %v1414_v33 = vpop.f32.mrf.mxu0 }
 0x188   :  { %635 = vmatpush1.msra.mxu1 %v574_v29  ;;  %v538_v14 = vadd.f32 %v1414_v33, %v281_v58  ;;  %v577_v26 = vmax.f32 %v523_v22, 0.0  ;;  %v590_v29 = vld [vmem:[%s1507_s5 + $0x28] sm:$0xff]  ;;  %v719_v33 = vld [vmem:[%s1508_s7] sm:$0xff] }
 0x189   :  { %636 = vmatprep.subr.mxu1 %v1108_v55  ;;  %v1418_v40 = vpop.f32.mrf.mxu0  ;;  %v849_v58 = vld [vmem:[%s1509_s9] sm:$0x7] }
 0x18a   :  { %637 = vmatpush1.msra.mxu1 %v573_v32  ;;  %v533_v16 = vadd.f32 %v1418_v40, %v276_v13  ;;  %v580_v20 = vmax.f32 %v538_v14, 0.0  ;;  %v591_v32 = vld [vmem:[%s1507_s5 + $0x30] sm:$0xff]  ;;  %v610_v40 = vpop.permute.xlu1 %609 }
 0x18b   :  { %638 = vmatprep.subr.mxu1 %v1108_v55  ;;  %v1073_v46 = vpop.f32.mrf.mxu0 }
 0x18c   :  { %639 = vmatpush1.msra.mxu1 %v572_v35  ;;  %v548_v9 = vadd.f32 %v1073_v46, %v291_v4  ;;  %v579_v24 = vmax.f32 %v533_v16, 0.0 }
 0x18d   :  { %640 = vmatprep.subr.mxu1 %v1108_v55  ;;  %v542_v52 = vpop.f32.mrf.mxu0 }
 0x18e   :  { %641 = vmatpush1.msra.mxu1 %v571_v38  ;;  %v543_v11 = vadd.f32 %v542_v52, %v286_v7  ;;  %v582_v15 = vmax.f32 %v548_v9, 0.0  ;;  %v615_v38 = vpop.permute.xlu0 %614  ;;  %v600_v49 = vpop.permute.xlu1 %599 }
 0x18f   :  { %642 = vmatprep.subr.mxu1 %v1108_v55  ;;  %v1076_v0 = vpop.f32.mrf.mxu0 }
 0x190   :  { %643 = vmatpush1.msra.mxu1 %v570_v42  ;;  %v558_v6 = vadd.f32 %v1076_v0, %v301_v56  ;;  %v581_v17 = vmax.f32 %v543_v11, 0.0  ;;  %v721_v56 = vld [vmem:[%s1508_s7 + $0x10] sm:$0xff] }
 0x191   :  { %644 = vmatprep.subr.mxu1 %v1108_v55  ;;  %v552_v5 = vpop.f32.mrf.mxu0 }
 0x192   :  { %645 = vmatpush1.msra.mxu1 %v569_v44  ;;  %v553_v57 = vadd.f32 %v552_v5, %v296_v63  ;;  %v584_v10 = vmax.f32 %v558_v6, 0.0  ;;  %v605_v45 = vpop.permute.xlu0 %604  ;;  %v740_v0 = vpop.permute.xlu1 %739 }
 0x193   :  { %646 = vmatprep.subr.mxu1 %v1108_v55 }
 0x194   :  { %647 = vmatpush1.msra.mxu1 %v568_v48  ;;  %v583_v12 = vmax.f32 %v553_v57, 0.0 }
 0x195   :  { %648 = vmatprep.subr.mxu1 %v1108_v55 }
 0x196   :  { %649 = vmatpush1.msra.mxu1 %v567_v51  ;;  %v730_v7 = vpop.permute.xlu1 %729 }
 0x197   :  { %650 = vmatprep.subr.mxu1 %v1108_v55 }
 0x198   :  { %651 = vmatpush1.msra.mxu1 %v566_v54  ;;  %v720_v54 = vld [vmem:[%s1508_s7 + $0x8] sm:$0xff] }
 0x199   :  { %652 = vmatprep.subr.mxu1 %v1108_v55 }
 0x19a   :  { %653 = vmatpush1.msra.mxu1 %v565_v61  ;;  %v745_v61 = vpop.permute.xlu0 %744 }
 0x19b   :  { %654 = vmatprep.subr.mxu1 %v1108_v55 }
 0x19c   :  { %655 = vmatpush1.msra.mxu1 %v564_v2 }
 0x19d   :  { %656 = vmatprep.subr.mxu1 %v1108_v55 }
 0x19e   :  { %657 = vmatpush1.msra.mxu1 %v563_v3  ;;  %v735_v3 = vpop.permute.xlu0 %734 }
 0x19f   :  { %658 = vmatprep.subr.mxu1 %v1108_v55 }
 0x1a0   :  { %659 = vmatpush1.msra.mxu1 %v562_v62 }
 0x1a1   :  { %660 = vmatprep.subr.mxu1 %v1108_v55 }
 0x1a2   :  { %661 = vmatpush1.msra.mxu1 %v561_v8  ;;  %v854_v11 = vpop.permute.xlu0 %853 }
 0x1a3   :  { %678 = vmatprep.subr.mxu1 %v1108_v55 }
 0x1a4   :  { %679 = vmatpush2.msra.mxu1 %v584_v10 }
 0x1a5   :  { %680 = vmatprep.subr.mxu1 %v1108_v55 }
 0x1a6   :  { %681 = vmatpush2.msra.mxu1 %v583_v12 }
 0x1a7   :  { %682 = vmatprep.subr.mxu1 %v1108_v55 }
 0x1a8   :  { %683 = vmatpush2.msra.mxu1 %v582_v15 }
 0x1a9   :  { %684 = vmatprep.subr.mxu1 %v1108_v55 }
 0x1aa   :  { %685 = vmatpush2.msra.mxu1 %v581_v17 }
 0x1ab   :  { %686 = vmatprep.subr.mxu1 %v1108_v55 }
 0x1ac   :  { %687 = vmatpush2.msra.mxu1 %v580_v20 }
 0x1ad   :  { %688 = vmatprep.subr.mxu1 %v1108_v55 }
 0x1ae   :  { %689 = vmatpush2.msra.mxu1 %v579_v24 }
 0x1af   :  { %690 = vmatprep.subr.mxu1 %v1108_v55 }
 0x1b0   :  { %691 = vmatpush2.msra.mxu1 %v578_v25 }
 0x1b1   :  { %692 = vmatprep.subr.mxu1 %v1108_v55 }
 0x1b2   :  { %693 = vmatpush2.msra.mxu1 %v577_v26 }
 0x1b3   :  { %695 = vmatmul.mubr.f32.vlgmr.msra.gmra.mxu1 %v585_v23 }
 0x1b4   :  { %960 = vmatprep.mubr.msk.f32.mxu1 %vm617_vm1, %v588_v27 }
 0x1b7   :  { %700 = vmatmul.mubr.f32.gmra.mxu1 %v587_v28 }
 0x1b8   :  { %961 = vmatprep.mubr.msk.f32.mxu1 %vm617_vm1, %v590_v29 }
 0x1bb   :  { %705 = vmatmul.mubr.f32.gmra.mxu1 %v589_v30 }
 0x1bc   :  { %962 = vmatprep.mubr.msk.f32.mxu1 %vm617_vm1, %v592_v31 }
 0x1bf   :  { %710 = vmatmul.mubr.f32.gmra.mxu1 %v591_v32 }
 0x1c0   :  { %1085 = vmatprep.mubr.msk.f32.mxu1 %vm747_vm2, %v719_v33 }
 0x273   :  { %v696_v34 = vpop.f32.mrf.mxu1 }
 0x274   :  { %v697_v50 = vadd.f32 %v696_v34, %v600_v49 }
 0x275   :  { %v698_v35 = vpop.f32.mrf.mxu1 }
 0x276   :  { %v715_v53 = vmax.f32 %v697_v50, 0.0 }
 0x277   :  { %v701_v36 = vpop.f32.mrf.mxu1 }
 0x278   :  { %v702_v47 = vadd.f32 %v701_v36, %v605_v45 }
 0x279   :  { %v703_v37 = vpop.f32.mrf.mxu1 }
 0x27a   :  { %v716_v52 = vmax.f32 %v702_v47, 0.0 }
 0x27b   :  { %v706_v39 = vpop.f32.mrf.mxu1 }
 0x27c   :  { %v707_v43 = vadd.f32 %v706_v39, %v610_v40 }
 0x27d   :  { %v708_v41 = vpop.f32.mrf.mxu1 }
 0x27e   :  { %v717_v51 = vmax.f32 %v707_v43, 0.0 }
 0x27f   :  { %v711_v42 = vpop.f32.mrf.mxu1 }
 0x280   :  { %v712_v44 = vadd.f32 %v711_v42, %v615_v38 }
 0x281   :  { %v713_v46 = vpop.f32.mrf.mxu1 }
 0x282   :  { %v718_v48 = vmax.f32 %v712_v44, 0.0 }
 0x284   :  { %1077 = vmatprep.subr.mxu1 %v718_v48 }
 0x285   :  { %1078 = vmatpush3.msra.mxu1 %v718_v48 }
 0x286   :  { %1079 = vmatprep.subr.mxu1 %v717_v51 }
 0x287   :  { %1080 = vmatpush3.msra.mxu1 %v717_v51 }
 0x288   :  { %1081 = vmatprep.subr.mxu1 %v716_v52 }
 0x289   :  { %1082 = vmatpush3.msra.mxu1 %v716_v52 }
 0x28a   :  { %1083 = vmatprep.subr.mxu1 %v715_v53 }
 0x28b   :  { %1084 = vmatpush3.msra.mxu1 %v715_v53 }
 0x28c   :  { %1086 = vmatmul.mubr.msk.f32.vlgmr.msra.gmra.mxu1 %vm747_vm2, %v720_v54 }
 0x28d   :  { %1088 = vmatprep.mubr.msk.f32.mxu1 %vm747_vm2, %v721_v56 }
 0x290   :  { %1089 = vmatmul.mubr.msk.f32.gmra.mxu1 %vm747_vm2, %v722_v59 }
 0x34c   :  { %v1087_v63 = vpop.f32.mrf.mxu1 }
 0x34d   :  { %v832_v5 = vadd.f32 %v1087_v63, %v735_v3 }
 0x34e   :  { %v826_v1 = vpop.f32.mrf.mxu1 }
 0x34f   :  { %v827_v8 = vadd.f32 %v826_v1, %v730_v7  ;;  %v846_v9 = vmax.f32 %v832_v5, 0.0 }
 0x350   :  { %v1090_v2 = vpop.f32.mrf.mxu1 }
 0x351   :  { %v842_v60 = vadd.f32 %v1090_v2, %v745_v61  ;;  %v845_v10 = vmax.f32 %v827_v8, 0.0 }
 0x352   :  { %v836_v4 = vpop.f32.mrf.mxu1 }
 0x353   :  { %v848_v62 = vmax.f32 %v842_v60, 0.0  ;;  %v837_v6 = vadd.f32 %v836_v4, %v740_v0 }
 0x355   :  { %v847_v57 = vmax.f32 %v837_v6, 0.0  ;;  %1092 = vmatpush3.msra.mxu0 %v848_v62 }
 0x356   :  { %1093 = vmatprep.subr.mxu0 %v1108_v55 }
 0x357   :  { %1094 = vmatpush3.msra.mxu0 %v847_v57 }
 0x358   :  { %1095 = vmatprep.subr.mxu0 %v1108_v55 }
 0x359   :  { %1096 = vmatpush3.msra.mxu0 %v846_v9 }
 0x35a   :  { %1097 = vmatprep.subr.mxu0 %v1108_v55 }
 0x35b   :  { %1098 = vmatpush3.msra.mxu0 %v845_v10 }
 0x35c   :  { %1100 = vmatmul.mubr.msk.f32.vlgmr.msra.gmra.mxu0 %vm747_vm2, %v849_v58 }
 0x41c   :  { %v925_v12 = vpop.f32.mrf.mxu0 }
 0x41d   :  { %v926_v13 = vadd.f32 %v925_v12, %v854_v11 }
 0x41e   :  { %v1101_v14 = vpop.f32.mrf.mxu0 }
 0x41f   :  { %930 = vst.msk [vmem:[%s1510_s11] sm:$0x7] %vm929_vm4, %v926_v13 }

</bundles_post_ra>
